<compile_context>
chip_gen: v7x
topology: tpu7x:2x2x1
jax: 0.10.0
libtpu: 0.0.40
codegen_flags: <defaults>
</compile_context>

<pallas_src>
import functools

import jax
import jax.numpy as jnp
from jax.experimental import pallas as pl
from jax.experimental.pallas import tpu as pltpu

_NEG_SLOPE = 0.1  # nn.LeakyReLU(negative_slope=0.1)


def _round_up(a, b):
    return ((a + b - 1) // b) * b


def _sublane_multiple(dtype):
    # Minimum sublane tiling: 8 rows (f32), 16 (bf16), 32 (int8 / fp8).
    return 8 * (4 // jnp.dtype(dtype).itemsize)


def _vmem_budget_bytes():
    """Generation-aware VMEM budget, with headroom for Mosaic internal scratch."""
    cap = 64 * 1024 * 1024  # conservative default (v7x has 64 MiB per TensorCore)
    try:
        info = pltpu.get_tpu_info()
        cap = int(getattr(info, "vmem_capacity_bytes", cap) or cap)
    except Exception:
        pass
    return int(cap * 0.70)


def _shrink_tiles(tm, tn, sub, n_pad, budget, footprint):
    """Halve tiles until the double-buffered footprint fits the VMEM budget."""
    while footprint(tm, tn) > budget and tm > sub:
        tm = max(sub, _round_up(tm // 2, sub))
    q = n_pad // 128
    while footprint(tm, tn) > budget and tn > 128:
        d = max(tn // 256, 1)
        while q % d:
            d -= 1
        tn = 128 * d
    return tm, tn


# ---------------------------------------------------------------------------
# Kernels
# ---------------------------------------------------------------------------

def _mlp_kernel_fullk(x_ref, w_ref, b_ref, o_ref, *, compute_dtype):
    """2-D grid: full K per block; fused matmul + bias + LeakyReLU epilogue."""
    a = x_ref[...]
    w = w_ref[...]
    if compute_dtype is not None:          # bf16 MXU operands, f32 accumulate
        a = a.astype(compute_dtype)
        w = w.astype(compute_dtype)
    y = jnp.dot(a, w, preferred_element_type=jnp.float32)
    y = y + b_ref[...].astype(jnp.float32)
    o_ref[...] = jnp.where(y >= 0, y, _NEG_SLOPE * y).astype(o_ref.dtype)


def _mlp_kernel_ktiled_f32out(x_ref, w_ref, b_ref, o_ref, *, compute_dtype):
    """3-D grid (K tiled), f32 output: accumulate directly into o_ref (no scratch)."""
    k = pl.program_id(2)

    @pl.when(k == 0)
    def _():
        o_ref[...] = jnp.zeros_like(o_ref)

    a = x_ref[...]
    w = w_ref[...]
    if compute_dtype is not None:
        a = a.astype(compute_dtype)
        w = w.astype(compute_dtype)
    o_ref[...] += jnp.dot(a, w, preferred_element_type=jnp.float32)

    @pl.when(k == pl.num_programs(2) - 1)
    def _():
        y = o_ref[...] + b_ref[...].astype(jnp.float32)
        o_ref[...] = jnp.where(y >= 0, y, _NEG_SLOPE * y)


def _mlp_kernel_ktiled_acc(x_ref, w_ref, b_ref, o_ref, acc_ref, *, compute_dtype):
    """3-D grid (K tiled), non-f32 output: accumulate into an f32 VMEM scratch."""
    k = pl.program_id(2)

    @pl.when(k == 0)
    def _():
        acc_ref[...] = jnp.zeros_like(acc_ref)

    a = x_ref[...]
    w = w_ref[...]
    if compute_dtype is not None:
        a = a.astype(compute_dtype)
        w = w.astype(compute_dtype)
    acc_ref[...] += jnp.dot(a, w, preferred_element_type=jnp.float32)

    @pl.when(k == pl.num_programs(2) - 1)
    def _():
        y = acc_ref[...] + b_ref[...].astype(jnp.float32)
        o_ref[...] = jnp.where(y >= 0, y, _NEG_SLOPE * y).astype(o_ref.dtype)


# ---------------------------------------------------------------------------
# Wrappers
# ---------------------------------------------------------------------------

def prepare_mlp_params(weight, bias, *, param_dtype=None):
    """One-time (amortized) parameter prep.

    weight: [n_hidden, n_in] (PyTorch nn.Linear layout); bias: [n_hidden].
    Returns (w_kn [n_in, n_pad], bias2d [1, n_pad], n_hidden): the transpose and
    the lane-multiple N padding happen once here, not per call / per tile.
    """
    n_hidden, n_in = weight.shape
    n_pad = _round_up(n_hidden, 128)
    w_kn = weight.T
    if param_dtype is not None:
        w_kn = w_kn.astype(param_dtype)
    if n_pad != n_hidden:
        w_kn = jnp.pad(w_kn, ((0, 0), (0, n_pad - n_hidden)))
        bias = jnp.pad(bias, (0, n_pad - n_hidden))
    return w_kn, bias.reshape(1, n_pad), n_hidden


def mlp_forward(x, w_kn, bias2d, n_hidden, *, tm=1024, tn=512, tk=512,
                compute_dtype=None):
    """Fused Linear + LeakyReLU(0.1); SharedDropout(p=0) / eval is identity.

    x: [..., n_in]; w_kn: [n_in, n_pad]; bias2d: [1, n_pad] (from prepare_mlp_params).
    """
    lead, n_in = x.shape[:-1], x.shape[-1]
    assert w_kn.shape[0] == n_in, "weight must be prepared as [n_in, n_pad]"
    n_pad = w_kn.shape[1]
    out_dtype = x.dtype

    M = 1
    for dim in lead:
        M *= dim
    x2 = x.reshape(M, n_in)

    sub = _sublane_multiple(x.dtype)
    xsz = x2.dtype.itemsize
    wsz = w_kn.dtype.itemsize
    bsz = bias2d.dtype.itemsize
    osz = jnp.dtype(out_dtype).itemsize

    # Lane-dense N tile that divides the (already 128-padded) weight N.
    q = n_pad // 128
    d = max(min(q, max(tn // 128, 1)), 1)
    while q % d:
        d -= 1
    tn = 128 * d

    # Dtype-aware M tile; activations are never padded (ragged edge -> masked store).
    tm = min(_round_up(tm, sub), _round_up(M, sub))

    budget = _vmem_budget_bytes()

    def fullk_bytes(tm_, tn_):
        # double-buffered x / weight / bias / output blocks
        return 2 * (tm_ * n_in * xsz + n_in * tn_ * wsz + tn_ * bsz + tm_ * tn_ * osz)

    use_fullk = fullk_bytes(sub, 128) <= budget

    if use_fullk:
        tm, tn = _shrink_tiles(tm, tn, sub, n_pad, budget, fullk_bytes)
    else:
        tk = min(_round_up(tk, 128), _round_up(n_in, 128))

        def tiled_bytes(tm_, tn_):
            return (2 * (tm_ * tk * xsz + tk * tn_ * wsz + tn_ * bsz + tm_ * tn_ * osz)
                    + (0 if out_dtype == jnp.float32 else tm_ * tn_ * 4))

        tm, tn = _shrink_tiles(tm, tn, sub, n_pad, budget, tiled_bytes)

    # Keep >= 2 parallel blocks so both TensorCores stay busy on v7x.
    grid_n = n_pad // tn
    grid_m = pl.cdiv(M, tm)
    if grid_m * grid_n < 2 and M > sub:
        tm = _round_up(pl.cdiv(M, 2), sub)
        grid_m = pl.cdiv(M, tm)

    cost = pl.CostEstimate(
        flops=2 * M * n_in * n_pad,
        transcendentals=0,
        bytes_accessed=int(x2.size * xsz + grid_m * w_kn.size * wsz
                           + M * n_pad * osz))

    if use_fullk:
        kernel = functools.partial(_mlp_kernel_fullk, compute_dtype=compute_dtype)
        vmem_limit = int(min(max(2 * fullk_bytes(tm, tn), 32 * 1024 * 1024), budget))
        out = pl.pallas_call(
            kernel,
            out_shape=jax.ShapeDtypeStruct((M, n_pad), out_dtype),
            grid_spec=pltpu.PrefetchScalarGridSpec(
                num_scalar_prefetch=0,
                grid=(grid_m, grid_n),
                in_specs=[
                    pl.BlockSpec((tm, n_in), lambda i, j: (i, 0)),   # activations
                    pl.BlockSpec((n_in, tn), lambda i, j: (0, j)),   # weight [K, N]
                    pl.BlockSpec((1, tn), lambda i, j: (0, j)),      # bias
                ],
                out_specs=pl.BlockSpec((tm, tn), lambda i, j: (i, j)),
            ),
            compiler_params=pltpu.CompilerParams(
                dimension_semantics=("parallel", "parallel"),
                vmem_limit_bytes=vmem_limit),
            cost_estimate=cost,
        )(x2, w_kn, bias2d)
    else:
        # Rare fallback: n_in too large for a full-K slab.  K padding of x/w here
        # is an extra HBM pass, accepted only on this seldom-taken path.
        k_pad = _round_up(n_in, tk)
        x2p = jnp.pad(x2, ((0, 0), (0, k_pad - n_in))) if k_pad != n_in else x2
        w_p = jnp.pad(w_kn, ((0, k_pad - n_in), (0, 0))) if k_pad != n_in else w_kn
        if out_dtype == jnp.float32:
            kernel = functools.partial(_mlp_kernel_ktiled_f32out,
                                       compute_dtype=compute_dtype)
            scratch = []
        else:
            kernel = functools.partial(_mlp_kernel_ktiled_acc,
                                       compute_dtype=compute_dtype)
            scratch = [pltpu.VMEM((tm, tn), jnp.float32)]
        out = pl.pallas_call(
            kernel,
            out_shape=jax.ShapeDtypeStruct((M, n_pad), out_dtype),
            grid_spec=pltpu.PrefetchScalarGridSpec(
                num_scalar_prefetch=0,
                grid=(grid_m, grid_n, k_pad // tk),
                in_specs=[
                    pl.BlockSpec((tm, tk), lambda i, j, k: (i, k)),
                    pl.BlockSpec((tk, tn), lambda i, j, k: (k, j)),
                    pl.BlockSpec((1, tn), lambda i, j, k: (0, j)),
                ],
                out_specs=pl.BlockSpec((tm, tn), lambda i, j, k: (i, j)),
                scratch_shapes=scratch,
            ),
            compiler_params=pltpu.CompilerParams(
                dimension_semantics=("parallel", "parallel", "arbitrary"),
                vmem_limit_bytes=budget),
            cost_estimate=cost,
        )(x2p, w_p, bias2d)

    out = out[:, :n_hidden]
    return out.reshape(*lead, n_hidden)


def orthogonal_init(key, rows, cols, dtype=jnp.float32):
    """Deterministic orthogonal init matching nn.init.orthogonal_ semantics."""
    flat_rows, flat_cols = (rows, cols) if rows >= cols else (cols, rows)
    a = jax.random.normal(key, (flat_rows, flat_cols), dtype=jnp.float32)
    qm, r = jnp.linalg.qr(a)
    d = jnp.sign(jnp.diagonal(r))          # sign correction, as torch does
    qm = qm * d[None, :]
    if rows < cols:
        qm = qm.T
    return qm[:rows, :cols].astype(dtype)


if __name__ == "__main__":
    key = jax.random.PRNGKey(0)
    k_x, k_w = jax.random.split(key)

    batch, seq, n_in, n_hidden = 2, 8, 32, 64

    x = jax.random.normal(k_x, (batch, seq, n_in), dtype=jnp.float32)
    weight = orthogonal_init(k_w, n_hidden, n_in)      # [n_hidden, n_in], torch layout
    bias = jnp.zeros((n_hidden,), dtype=jnp.float32)

    # Reference: Linear -> LeakyReLU(0.1); SharedDropout(p=0)/eval is identity.
    ref = x @ weight.T + bias
    ref = jnp.where(ref >= 0, ref, 0.1 * ref)

    # f32 path (exact numerics).
    w_kn, b2, nh = prepare_mlp_params(weight, bias)
    out = mlp_forward(x, w_kn, b2, nh)
    out = jax.block_until_ready(out)
    assert out.shape == (batch, seq, n_hidden)
    assert jnp.allclose(out, ref, atol=1e-5, rtol=1e-5)

    # bf16 MXU operands, f32 accumulate (the fast configuration on all generations).
    w_kn_bf, b2_bf, _ = prepare_mlp_params(weight, bias, param_dtype=jnp.bfloat16)
    out_bf = mlp_forward(x, w_kn_bf, b2_bf, nh, compute_dtype=jnp.bfloat16)
    out_bf = jax.block_until_ready(out_bf)
    assert out_bf.shape == (batch, seq, n_hidden)
    assert jnp.allclose(out_bf, ref, atol=1e-1, rtol=1e-1)

    print("KERNEL_OK")
</pallas_src>

<mosaic_0001>
module attributes {stable_mosaic.version = 11 : i64} {
  func.func @_mlp_kernel_fullk(%arg0: i32, %arg1: i32, %arg2: memref<8x32xf32, #tpu.memory_space<vmem>>, %arg3: memref<32x128xf32, #tpu.memory_space<vmem>>, %arg4: memref<1x128xf32, #tpu.memory_space<vmem>>, %arg5: memref<8x128xf32, #tpu.memory_space<vmem>>) attributes {dimension_semantics = [#tpu.dimension_semantics<parallel>, #tpu.dimension_semantics<parallel>], iteration_bounds = array<i64: 2, 1>, scalar_prefetch = 0 : i64, scratch_operands = 0 : i64, tpu.core_type = #tpu.core_type<tc>, window_params = [{transform_indices = @transform_0, window_bounds = array<i64: 8, 32>}, {transform_indices = @transform_1, window_bounds = array<i64: 32, 128>}, {transform_indices = @transform_2, window_bounds = array<i64: 1, 128>}, {transform_indices = @transform_3, window_bounds = array<i64: 8, 128>}]} {
    %c0 = arith.constant 0 : index
    %c0_0 = arith.constant 0 : index
    %0 = vector.load %arg2[%c0, %c0_0] : memref<8x32xf32, #tpu.memory_space<vmem>>, vector<8x32xf32>
    %c0_1 = arith.constant 0 : index
    %c0_2 = arith.constant 0 : index
    %1 = vector.load %arg3[%c0_1, %c0_2] : memref<32x128xf32, #tpu.memory_space<vmem>>, vector<32x128xf32>
    %cst = arith.constant dense<0.000000e+00> : vector<8x128xf32>
    %2 = tpu.matmul %0, %1, %cst {dimension_numbers = #tpu.dot_dimension_numbers<[1], [0], [0], [1], [0, 0, 1, 1], [], []>} : vector<8x32xf32>, vector<32x128xf32>, vector<8x128xf32> -> vector<8x128xf32>
    %c0_3 = arith.constant 0 : index
    %c0_4 = arith.constant 0 : index
    %3 = vector.load %arg4[%c0_3, %c0_4] : memref<1x128xf32, #tpu.memory_space<vmem>>, vector<1x128xf32>
    %4 = vector.broadcast %3 : vector<1x128xf32> to vector<8x128xf32>
    %5 = arith.addf %2, %4 : vector<8x128xf32>
    %cst_5 = arith.constant 0.000000e+00 : f32
    %6 = vector.broadcast %cst_5 : f32 to vector<8x128xf32>
    %7 = arith.cmpf oge, %5, %6 : vector<8x128xf32>
    %cst_6 = arith.constant 1.000000e-01 : f32
    %8 = vector.broadcast %cst_6 : f32 to vector<8x128xf32>
    %9 = arith.mulf %8, %5 : vector<8x128xf32>
    %10 = arith.select %7, %5, %9 : vector<8x128xi1>, vector<8x128xf32>
    %c0_7 = arith.constant 0 : index
    %c0_8 = arith.constant 0 : index
    %11 = vector.load %arg5[%c0_7, %c0_8] : memref<8x128xf32, #tpu.memory_space<vmem>>, vector<8x128xf32>
    tpu.vector_store %arg5[%c0_7, %c0_8], %10 {strides = array<i32>} : memref<8x128xf32, #tpu.memory_space<vmem>>, vector<8x128xf32>,
    return
  }
  func.func @transform_0(%arg0: i32, %arg1: i32) -> (i32, i32) {
    %c0_i32 = arith.constant 0 : i32
    %c0_i32_0 = arith.constant 0 : i32
    return %arg0, %c0_i32 : i32, i32
  }
  func.func @transform_1(%arg0: i32, %arg1: i32) -> (i32, i32) {
    %c0_i32 = arith.constant 0 : i32
    %c0_i32_0 = arith.constant 0 : i32
    return %c0_i32, %arg1 : i32, i32
  }
  func.func @transform_2(%arg0: i32, %arg1: i32) -> (i32, i32) {
    %c0_i32 = arith.constant 0 : i32
    %c0_i32_0 = arith.constant 0 : i32
    return %c0_i32, %arg1 : i32, i32
  }
  func.func @transform_3(%arg0: i32, %arg1: i32) -> (i32, i32) {
    %c0_i32 = arith.constant 0 : i32
    return %arg0, %arg1 : i32, i32
  }
}

</mosaic_0001>

<bundles_post_ra>
// kernel: tpu_custom_call.1
= control target key start
LH: loop header
LB: loop body
LE: loop exit
PB: predicated region body
PF: predicated region fallthrough
CT: control target
= control target key end

     0   :  { %8 = vsyncpa [#allocation3], 0  ;;  %s953_s0 = inlined_call_operand.hbm [shape: f32[16,32], index: 0, kind: input, shape index: {}]   ;;  %s954_s1 = inlined_call_operand.hbm [shape: f32[32,128], index: 1, kind: input, shape index: {}]   ;;  %s955_s2 = inlined_call_operand.vmem [shape: f32[1,128], index: 2, kind: input, shape index: {}]   ;;  %s956_s3 = inlined_call_operand.hbm [shape: f32[16,128], index: 3, kind: output, shape index: {}]  }
   0x1   :  { %10 = vsyncpa [#allocation3 + $0x1], 0 }
   0x2   :  { %11 = vsyncpa [#allocation6], 0 }
   0x3   :  { %12 = vsyncpa [#allocation4], 0 }
   0x4   :  { %14 = vsyncpa [#allocation4 + $0x1], 0  ;;  %s736_s12 = smov 0   ;;  %s738_s13 = smov 0  }
   0x5   :  { %s740_s14 = smov 0   ;;  %s742_s15 = smov 0  }
   0x6   :  { %s744_s16 = smov 0   ;;  %s746_s17 = smov 0  }
   0x7 LB: > { %s444_s18 = sadd.s32 4294967295, %s706_s17   ;;  %s445_s19 = sadd.s32 4294967294, %s706_s17   ;;  %s706_s17 = sphi %s746_s17, %s20_s17   ;;  %s702_s16 = sphi %s744_s16, %s980_s16   ;;  %s698_s15 = sphi %s742_s15, %s979_s15   ;;  %s694_s14 = sphi %s740_s14, %s978_s14   ;;  %s690_s13 = sphi %s738_s13, %s977_s13   ;;  %s686_s12 = sphi %s736_s12, %s976_s12  }
   0x8   : > { %p52_p0 = scmp.ne.s32.totalorder %s690_s13, %s686_s12  ;;  %p770_p1 = scmp.eq.s32.totalorder %s444_s18, 0 }
   0x9   : > { %p774_p2 = scmp.eq.s32.totalorder %s444_s18, 1  ;;  %p136_p3 = scmp.eq.s32.totalorder %s445_s19, 1 }
   0xa   : > { %s961_s20 = scalar_select %p770_p1, 1, 0 }
   0xb   : > { %s962_s21 = scalar_select %p774_p2, 1, 0 }
   0xc   : > { %p780_p4 = por %p770_p1, %p52_p0  ;;  %p446_p5 = scmp.ge.s32.totalorder %s706_s17, 1 }
   0xd   : > { %p785_p6 = por %p136_p3, %p52_p0  ;;  %p143_p7 = scmp.lt.s32.totalorder %s706_s17, 3 }
   0xe   : > { %s963_s22 = scalar_select %p780_p4, 1, 0 }
   0xf   : > { %s964_s23 = scalar_select %p785_p6, 1, 0 }
  0x10   : > { %p790_p8 = pnand %p446_p5, %p143_p7  ;;  %s708_s25 = smov [#allocation5]  }
  0x11   : > { %s157_s26 = sshll.u32 %s708_s25, 4  ;;  %s32_s28 = sadd.s32 1, %s702_s16  ;;  %s158_s26 = int_to_ptr.vmem [resolvable:$true] %s157_s26 }
  0x12   : > { %s965_s24 = scalar_select %p790_p8, 1, 0 }
  0x13   : > { %p492_p9 = pneg %p790_p8  ;;  %s562_s4 = scalar_lea.hbm %s954_s1, 512 }
  0x14   : > { %p563_p12 = scmp.ne.s32.totalorder %s954_s1, %s562_s4  ;;  %p569_p5 = scmp.lt.u32.totalorder %s562_s4, %s954_s1 }
  0x15   : > { %p799_p11 = pnand %p492_p9, %p770_p1 }
  0x17   : > { %p564_p13 = pneg %p799_p11 }
  0x19   : > { %p565_p0 = pnand %p564_p13, %p563_p12 }
  0x1b   : > { %p566_p3 = pneg %p565_p0 }
  0x1d   : > { %p571_p7 = pnand %p569_p5, %p566_p3 }
  0x1f   : > { %574 = shalt.err (!%p571_p7)
}
  0x20   : > { %s575_s9 = scalar_lea.vmem %s158_s26, 512  ;;  %p583_p1 = scmp.lt.s32.totalorder %s158_s26, %s158_s26 }
  0x21   : > { %p576_p9 = scmp.ne.s32.totalorder %s158_s26, %s575_s9  ;;  %p584_p4 = scmp.lt.s32.totalorder %s575_s9, %s575_s9 }
  0x23   : > { %p578_p10 = pnand %p576_p9, %p564_p13  ;;  %p585_p8 = por %p584_p4, %p583_p1 }
  0x25   : > { %p579_p6 = pneg %p578_p10 }
  0x27   : > { %p586_p2 = pnand %p585_p8, %p579_p6 }
  0x29   : > { %589 = shalt.err (!%p586_p2)
}
  0x2a   : > { %s709_s10 = smov 128   ;;  %s710_s11 = smov 8  }
  0x2b   : > { %495 = dma.hbm_to_vmem [thread:$0]  (!%p799_p11), %s954_s1, 512, %s158_s26, [#allocation6], %s709_s10, %s709_s10, %s710_s11  }
  0x2c   : > { %p34_p1 = scmp.ge.s32.totalorder %s32_s28, 2  ;;  %s39_s25 = sadd.s32 1, %s694_s14 }
  0x2d   : > { %p46_p2 = scmp.ne.s32.totalorder %s694_s14, %s690_s13  ;;  %p47_p4 = scmp.eq.s32.totalorder %s706_s17, 0 }
  0x2e   : > { %s982_s28 = smov (%p34_p1, %s32_s28), 0  ;;  %p968_p8 = scmp.ne.s32.totalorder %s962_s21, 0 }
  0x2f   : > { %p826_p6 = por %p47_p4, %p46_p2  ;;  %s36_s27 = ssub.s32 %s702_s16, %s982_s28 }
  0x30   : > { %p832_p10 = por %p968_p8, %p46_p2  ;;  %p505_p12 = scmp.lt.s32.totalorder %s706_s17, 2 }
  0x31   : > { %p37_p11 = scmp.eq.s32.totalorder %s36_s27, 0  ;;  %s177_s26 = sand.u32 1, %s694_s14  }
  0x32   : > { %s450_s4 = sshll.u32 %s177_s26, 3  ;;  %s451_s6 = sshll.u32 %s702_s16, 7 }
  0x33   : > { %s841_s5 = scalar_select %p37_p11, %s694_s14, %s39_s25  }
  0x34   : > { %s847_s9 = scalar_lea.hbm %s953_s0, %s451_s6  ;;  %s181_s21 = scalar_lea.vmem [#allocation2], %s450_s4 }
  0x35   : > { %s188_s10 = sshll.u32 %s181_s21, 4  ;;  %p853_p13 = pnand %p505_p12, %p826_p6  ;;  %s849_s10 = int_to_ptr.vmem [resolvable:$true] %s188_s10 }
  0x36   : > { %s178_s18 = scalar_lea.sflag [#allocation3], %s177_s26  ;;  %s590_s19 = scalar_lea.hbm %s847_s9, 128 }
  0x37   : > { %p591_p0 = scmp.ne.s32.totalorder %s847_s9, %s590_s19  ;;  %p592_p3 = pneg %p853_p13 }
  0x38   : > { %s595_s4 = scalar_lea.hbm %s953_s0, 256  ;;  %p596_p9 = scmp.lt.u32.totalorder %s847_s9, %s953_s0 }
  0x39   : > { %p593_p5 = pnand %p592_p3, %p591_p0  ;;  %p597_p1 = scmp.lt.u32.totalorder %s595_s4, %s590_s19 }
  0x3a   : > { %p599_p4 = scmp.lt.u32.totalorder %s590_s19, %s847_s9 }
  0x3b   : > { %p594_p7 = pneg %p593_p5  ;;  %p598_p2 = por %p597_p1, %p596_p9 }
  0x3d   : > { %p600_p6 = por %p599_p4, %p598_p2 }
  0x3f   : > { %p601_p8 = pnand %p600_p6, %p594_p7 }
  0x41   : > { %604 = shalt.err (!%p601_p8)
}
  0x42   : > { %s605_s26 = scalar_lea.vmem %s849_s10, 128  ;;  %s711_s7 = smov [#allocation2]  }
  0x43   : > { %p606_p12 = scmp.ne.s32.totalorder %s849_s10, %s605_s26  ;;  %s610_s8 = sshll.u32 %s711_s7, 4  ;;  %s611_s8 = int_to_ptr.vmem [resolvable:$false] %s610_s8 }
  0x44   : > { %s612_s21 = scalar_lea.vmem %s611_s8, 256  ;;  %p613_p5 = scmp.lt.s32.totalorder %s849_s10, %s611_s8 }
  0x45   : > { %p608_p11 = pnand %p606_p12, %p592_p3  ;;  %p614_p9 = scmp.lt.s32.totalorder %s612_s21, %s605_s26 }
  0x47   : > { %p609_p0 = pneg %p608_p11  ;;  %p615_p1 = por %p614_p9, %p613_p5 }
  0x49   : > { %p616_p2 = pnand %p615_p1, %p609_p0 }
  0x4b   : > { %619 = shalt.err (!%p616_p2)
}
  0x4c   : > { %499 = dma.hbm_to_vmem [thread:$0]  (!%p853_p13), %s847_s9, 128, %s849_s10, %s178_s18  }
  0x4d   : > { %p971_p7 = scmp.ne.s32.totalorder %s965_s24, 0 }
  0x4e   : > { %s885_s19 = sand.u32 (!%p971_p7), 1, %s690_s13   ;;  %p972_p3 = scmp.ne.s32.totalorder (!%p971_p7), %s963_s22, 0 }
  0x4f   : > { %197 = sbr.rel (%p971_p7) target bundleno = 332 (0x14c), region = 32  ;;  %s453_s25 = sshll.u32 (!%p971_p7), %s885_s19, 3 }
  0x50   : > { %s200_s27 = scalar_lea.sflag (!%p971_p7), [#allocation3], %s885_s19  ;;  %s203_s4 = scalar_lea.vmem (!%p971_p7), [#allocation2], %s453_s25 }
  0x56   : > { %673 = dma.done.wait (%p972_p3), %s200_s27, 128  }
  0x57   : > { %675 = vsyncadd (%p972_p3), %s200_s27, 4294967168  ;;  %p973_p4 = scmp.ne.s32.totalorder %s961_s20, 0 }
  0x59   : > { %677 = dma.done.wait (%p973_p4), [#allocation6], 512  }
  0x5a   : > { %679 = vsyncadd (%p973_p4), [#allocation6], 4294966784  ;;  %v712_v0 = vmov 0.0|0.0   ;;  %vm713_vm0 = vmmov 0   ;;  %v714_v1 = vmov 0.0   ;;  %v237_v2 = vld [vmem:[#allocation5] sm:$0xff] }
  0x5b   : > { %478 = vmatprep.subr.bf16.mxu0 %v712_v0  ;;  %475 = vmatprep.mubr.msk.f32.mxu0 %vm713_vm0, %v714_v1  ;;  %v238_v3 = vld [vmem:[#allocation5 + $0x8] sm:$0xff]  ;;  %v239_v4 = vld [vmem:[#allocation5 + $0x10] sm:$0xff]  ;;  %v240_v6 = vld [vmem:[#allocation5 + $0x18] sm:$0xff]  ;;  %vm248_vm1 = vcmask 261120   ;;  %s459_s24 = sshll.u32 %s698_s15, 7  ;;  %s232_s9 = scalar_lea.vmem [#allocation7], %s453_s25 }
  0x5c   : > { %v479_v5 = vpack.c.bf16 %v238_v3, %v237_v2  ;;  %v482_v7 = vpack.c.bf16 %v240_v6, %v239_v4  ;;  %v236_v8 = vld [vmem:[%s203_s4] sm:$0xff]  ;;  %s341_s10 = sshll.u32 %s232_s9, 4  ;;  %s904_s29 = scalar_lea.hbm %s956_s3, %s459_s24  ;;  %s906_s10 = int_to_ptr.vmem [resolvable:$true] %s341_s10 }
  0x5d   : > { %v456_v9 = vld [vmem:[%s955_s2] ss:$0 sm:$0xff]  ;;  %s327_s6 = scalar_lea.sflag [#allocation4], %s885_s19  ;;  %s620_s26 = scalar_lea.vmem %s906_s10, 128 }
  0x5e   : > { %480 = vmatpush3.bf16.msra.mxu0 %v479_v5  ;;  %p621_p13 = scmp.ne.s32.totalorder %s906_s10, %s620_s26  ;;  %s715_s15 = smov [#allocation7]  }
  0x5f   : > { %481 = vmatprep.subr.bf16.mxu0 %v712_v0  ;;  %s624_s7 = sshll.u32 %s715_s15, 4  ;;  %s625_s7 = int_to_ptr.vmem [resolvable:$false] %s624_s7 }
  0x60   : > { %p622_p6 = pnand %p621_p13, %p832_p10  ;;  %s626_s8 = scalar_lea.vmem %s625_s7, 256 }
  0x61   : > { %p627_p12 = scmp.lt.s32.totalorder %s906_s10, %s625_s7  ;;  %p628_p11 = scmp.lt.s32.totalorder %s626_s8, %s620_s26 }
  0x62   : > { %483 = vmatpush3.bf16.msra.mxu0 %v482_v7  ;;  %p623_p8 = pneg %p622_p6 }
  0x63   : > { %p629_p0 = por %p628_p11, %p627_p12 }
  0x65   : > { %476 = vmatmul.mubr.msk.f32.vlgmr.msra.gmra.mrb[0].mxu0 %vm248_vm1, %v236_v8  ;;  %p630_p5 = pnand %p629_p0, %p623_p8 }
 0x138   : > { %v318_v10 = vpop.f32.mrb[0].mxu0 }
 0x139   : > { %v319_v11 = vadd.f32 %v456_v9, %v318_v10  ;;  %v477_v12 = vpop.f32.mrb[1].mxu0 }
 0x13b   : > { %vm322_vm2 = vcmp.ge.f32.partialorder %v319_v11, 0.0  ;;  %v323_v13 = vmul.f32 0.1, %v319_v11 }
 0x13d   : > { %v324_v14 = vsel %vm322_vm2, %v319_v11, %v323_v13 }
 0x13e   : > { %325 = vst [vmem:[%s232_s9] sm:$0xff] %v324_v14 }
 0x13f   : > { %633 = shalt.err (!%p630_p5)
}
 0x140   : > { %s634_s21 = scalar_lea.hbm %s904_s29, 128  ;;  %s638_s27 = scalar_lea.hbm %s956_s3, 256 }
 0x141   : > { %p635_p9 = scmp.ne.s32.totalorder %s904_s29, %s634_s21  ;;  %p639_p7 = scmp.lt.u32.totalorder %s904_s29, %s956_s3 }
 0x142   : > { %p640_p3 = scmp.lt.u32.totalorder %s638_s27, %s634_s21  ;;  %p642_p13 = scmp.lt.u32.totalorder %s634_s21, %s904_s29 }
 0x143   : > { %p636_p1 = pnand %p635_p9, %p832_p10 }
 0x144   : > { %p641_p4 = por %p640_p3, %p639_p7 }
 0x145   : > { %p637_p2 = pneg %p636_p1 }
 0x146   : > { %p643_p6 = por %p642_p13, %p641_p4 }
 0x148   : > { %p644_p8 = pnand %p643_p6, %p637_p2 }
 0x14a   : > { %647 = shalt.err (!%p644_p8)
}
 0x14b   : > { %490 = dma.vmem_to_hbm [thread:$0]  (%p832_p10), %s906_s10, 128, %s904_s29, %s327_s6  }
 0x14c PF: > { %s353_s22 = sand.u32 1, %s686_s12   ;;  %p974_p12 = scmp.ne.s32.totalorder %s964_s23, 0 }
 0x14d   : > { %p975_p11 = scmp.ge.s32.totalorder %s706_s17, 2  ;;  %s354_s24 = scalar_lea.sflag [#allocation4], %s353_s22 }
 0x14f   : > { %p501_p0 = pnand %p975_p11, %p974_p12 }
 0x151   : > { %681 = dma.done.wait (!%p501_p0), %s354_s24, 128  }
 0x152   : > { %683 = vsyncadd (!%p501_p0), %s354_s24, 4294967168  ;;  %s20_s17 = sadd.s32 1, %s706_s17   ;;  %s976_s12 = smov %s690_s13 }
 0x153   : > { %p17_p5 = scmp.ge.s32.totalorder %s20_s17, 4   ;;  %s977_s13 = smov %s694_s14 }
 0x154   : > { %s978_s14 = smov %s841_s5  ;;  %s979_s15 = smov %s702_s16 }
 0x155   : > { %s980_s16 = smov %s982_s28  ;;  %19 = sbr.rel (!%p17_p5) target bundleno = 7 (0x7), region = 85 }
 0x15c   :  { %359 = vsyncpa [#allocation3], 1 }
 0x15d   :  { %361 = vsyncpa [#allocation3 + $0x1], 1 }
 0x15e   :  { %362 = vsyncpa [#allocation6], 1 }
 0x15f   :  { %363 = vsyncpa [#allocation4], 1 }
 0x160   :  { %365 = vsyncpa [#allocation4 + $0x1], 1 }

</bundles_post_ra>
